<compile_context>
chip_gen: v6e
topology: v6e:2x2x1
jax: 0.10.0
libtpu: 0.0.40
codegen_flags: <defaults>
</compile_context>

<pallas_src>
import functools

import jax
import jax.numpy as jnp
from jax import lax
from jax.experimental import pallas as pl
from jax.experimental.pallas import tpu as pltpu

LANE = 128


def _round_up(x, m):
    return ((x + m - 1) // m) * m


def _vmem_capacity_bytes():
    try:
        return int(pltpu.get_tpu_info().vmem_capacity_bytes)
    except Exception:
        return 64 * 1024 * 1024  # conservative fallback (v7x physical VMEM)


# --------------------------------------------------------------------------
# Path A: fused conv + instance norm (stride == 1), no im2col materialization
# --------------------------------------------------------------------------
def _fused_kernel(x_ref, w_ref, prm_ref, mask_ref, o_ref, *,
                  k, Wp, L_out, inv_count, eps, instance_norm):
    # x_ref:    (1, Cin, L_in)   flattened reflect-padded image (compute dtype)
    # w_ref:    (k*k, Ct, Cin)   conv weight, tap-major
    # prm_ref:  (Ct, 3)          packed [bias, gamma, beta] (f32)
    # mask_ref: (1, L_out)       1.0 at valid output lanes, 0.0 elsewhere (f32)
    # o_ref:    (1, Ct, L_out)
    acc = None
    for idx in range(k * k):
        di, dj = divmod(idx, k)
        s = di * Wp + dj
        xs = x_ref[0, :, s:s + L_out]                          # (Cin, L_out)
        d = jnp.dot(w_ref[idx], xs, preferred_element_type=jnp.float32)
        acc = d if acc is None else acc + d                    # (Ct, L_out) f32

    if not instance_norm:
        o_ref[0] = (acc + prm_ref[:, 0:1]).astype(o_ref.dtype)
        return

    # InstanceNorm: bias cancels -> never added.  Stats only over valid lanes.
    m = mask_ref[...]                                          # (1, L_out)
    am = acc * m
    mean = jnp.sum(am, axis=1, keepdims=True) * inv_count      # (Ct, 1)
    var = jnp.sum(am * acc, axis=1, keepdims=True) * inv_count - mean * mean
    # TODO(synk): for very large P the E[x^2]-E[x]^2 form can cancel; switch to
    # a two-pass / compensated variance when P is in the 1e5+ range.
    scale = prm_ref[:, 1:2] * lax.rsqrt(var + eps)             # (Ct, 1)
    shift = prm_ref[:, 2:3] - mean * scale
    o_ref[0] = (acc * scale + shift).astype(o_ref.dtype)


def _conv_layer_fused(xp, weight, bias, gamma, beta, *, k, instance_norm,
                      eps, compute_dtype, out_dtype, vmem_cap):
    N, Cin, Hp, Wp = xp.shape
    Cout = weight.shape[0]
    H_out = Hp - k + 1
    W_out = Wp - k + 1
    L = Hp * Wp
    L_out = _round_up(L, LANE)
    L_in = L_out + _round_up((k - 1) * (Wp + 1), LANE)   # slack so shifted slices stay in bounds

    x_flat = xp.reshape(N, Cin, L).astype(compute_dtype)
    x_flat = jnp.pad(x_flat, ((0, 0), (0, 0), (0, L_in - L)))

    # validity mask over flattened output lanes (row < H_out and col < W_out)
    q = jnp.arange(L_out)
    mask = ((q // Wp < H_out) & (q % Wp < W_out) & (q < L)).astype(jnp.float32)
    mask = mask[None, :]                                        # (1, L_out)

    w_tap = jnp.transpose(weight, (2, 3, 0, 1)).reshape(k * k, Cout, Cin)
    w_tap = w_tap.astype(compute_dtype)
    prm = jnp.stack([bias, gamma, beta], axis=1).astype(jnp.float32)   # (Cout, 3)

    # Megacore: with no batch parallelism, split Cout across the two v7x cores.
    n_ct = 2 if (N == 1 and Cout % 16 == 0) else 1
    Ct = Cout // n_ct

    kernel = functools.partial(_fused_kernel, k=k, Wp=Wp, L_out=L_out,
                               inv_count=1.0 / float(H_out * W_out),
                               eps=eps, instance_norm=instance_norm)

    cbytes = jnp.dtype(compute_dtype).itemsize
    obytes = jnp.dtype(out_dtype).itemsize
    vmem_est = (2 * Cin * L_in * cbytes                 # image (double-buffered)
                + 2 * Cin * L_out * cbytes              # shifted-slice temporaries
                + k * k * Cout * Cin * cbytes + Cout * 3 * 4 + L_out * 4
                + 2 * Ct * L_out * obytes               # output block (double-buffered)
                + 2 * Ct * L_out * 4)                   # f32 accumulator + temp
    vmem_limit = int(min(int(0.9 * vmem_cap), max(2 * vmem_est, 32 * 1024 * 1024)))

    cost = pl.CostEstimate(
        flops=2 * N * Cout * Cin * k * k * L_out,
        transcendentals=0,
        bytes_accessed=(N * Cin * L_in * cbytes + k * k * Cout * Cin * cbytes
                        + Cout * 3 * 4 + L_out * 4 + N * Cout * L_out * obytes))

    out = pl.pallas_call(
        kernel,
        out_shape=jax.ShapeDtypeStruct((N, Cout, L_out), out_dtype),
        grid_spec=pltpu.PrefetchScalarGridSpec(
            num_scalar_prefetch=0,
            grid=(N, n_ct),
            in_specs=[
                pl.BlockSpec((1, Cin, L_in), lambda b, c: (b, 0, 0)),    # image
                pl.BlockSpec((k * k, Ct, Cin), lambda b, c: (0, c, 0)),  # weight
                pl.BlockSpec((Ct, 3), lambda b, c: (c, 0)),              # bias/gamma/beta
                pl.BlockSpec((1, L_out), lambda b, c: (0, 0)),           # valid-lane mask
            ],
            out_specs=pl.BlockSpec((1, Ct, L_out), lambda b, c: (b, c, 0)),
        ),
        compiler_params=pltpu.CompilerParams(
            dimension_semantics=("parallel", "parallel"),
            vmem_limit_bytes=vmem_limit),
        cost_estimate=cost,
    )(x_flat, w_tap, prm, mask)

    out = out[:, :, :L].reshape(N, Cout, Hp, Wp)[:, :, :H_out, :W_out]
    return out


# --------------------------------------------------------------------------
# Path B: tiled im2col fallback (stride != 1 or problem too large for Path A)
# --------------------------------------------------------------------------
def _im2col_kernel(p_ref, w_ref, prm_ref, o_ref, s_ref, ss_ref, *,
                   eps, instance_norm, P, TP, P_pad):
    # p_ref:   (1, K, TP)  im2col patch tile (lane axis = spatial)
    # w_ref:   (Cout, K)   flattened conv weight
    # prm_ref: (Cout, 3)   packed [bias, gamma, beta] (f32)
    # o_ref:   (1, Cout, P_pad) resident per-batch block (instance_norm) /
    #          (1, Cout, TP)    per-tile block (no instance_norm)
    p = pl.program_id(1)
    n_p = pl.num_programs(1)

    acc = jnp.dot(w_ref[...], p_ref[0], preferred_element_type=jnp.float32)  # (Cout, TP)

    if not instance_norm:
        o_ref[0] = (acc + prm_ref[:, 0:1]).astype(o_ref.dtype)
        return

    # InstanceNorm: bias cancels -> never added; zero-padded spatial columns
    # contribute exactly 0 to both sums -> no iota/where mask needed.
    @pl.when(p == 0)
    def _():
        s_ref[...] = jnp.zeros_like(s_ref)
        ss_ref[...] = jnp.zeros_like(ss_ref)

    s_ref[...] += jnp.sum(acc, axis=1, keepdims=True)
    ss_ref[...] += jnp.sum(acc * acc, axis=1, keepdims=True)

    col0 = pl.multiple_of(p * TP, LANE)
    o_ref[0, :, pl.ds(col0, TP)] = acc.astype(o_ref.dtype)

    @pl.when(p == n_p - 1)
    def _():
        inv_n = 1.0 / float(P)
        mean = s_ref[...] * inv_n
        var = ss_ref[...] * inv_n - mean * mean              # biased variance
        scale = prm_ref[:, 1:2] * lax.rsqrt(var + eps)
        shift = prm_ref[:, 2:3] - mean * scale

        # chunked normalize of the resident block (smaller live ranges than one
        # monolithic (Cout, P_pad) read-modify-write)
        def _norm_chunk(c, carry):
            c0 = pl.multiple_of(c * TP, LANE)
            blk = o_ref[0, :, pl.ds(c0, TP)]
            o_ref[0, :, pl.ds(c0, TP)] = (blk * scale + shift).astype(o_ref.dtype)
            return carry
        lax.fori_loop(0, P_pad // TP, _norm_chunk, 0, unroll=True)


def _conv_layer_im2col(xp, weight, bias, gamma, beta, *, k, stride, instance_norm,
                       eps, compute_dtype, out_dtype, vmem_cap):
    N, Cin, Hp, Wp = xp.shape
    Cout = weight.shape[0]
    H_out = (Hp - k) // stride + 1
    W_out = (Wp - k) // stride + 1
    P = H_out * W_out
    K = Cin * k * k

    # TODO(synk): this path still inflates input HBM traffic ~k^2x; fold the
    # im2col into the kernel with halo'd row-slab DMAs (pl.ANY input +
    # pltpu.make_async_copy) as already done for the stride==1 fused path.
    xpc = xp.astype(compute_dtype)
    cols = []
    for di in range(k):
        for dj in range(k):
            cols.append(xpc[:, :,
                            di:di + (H_out - 1) * stride + 1:stride,
                            dj:dj + (W_out - 1) * stride + 1:stride])
    patches = jnp.stack(cols, axis=2).reshape(N, K, P)        # (N, K, P), spatial on lanes

    # Balanced lane tiling: as few / as large tiles as practical, last tile not
    # mostly padding; small problems collapse to a single tile.
    TP_MAX = 1024
    n_pt = max(1, -(-P // TP_MAX))
    TP = _round_up(-(-P // n_pt), LANE)
    P_pad = TP * n_pt
    if P_pad != P:
        patches = jnp.pad(patches, ((0, 0), (0, 0), (0, P_pad - P)))

    w_flat = weight.reshape(Cout, K).astype(compute_dtype)
    prm = jnp.stack([bias, gamma, beta], axis=1).astype(jnp.float32)

    kernel = functools.partial(_im2col_kernel, eps=eps, instance_norm=instance_norm,
                               P=P, TP=TP, P_pad=P_pad)

    if instance_norm:
        out_spec = pl.BlockSpec((1, Cout, P_pad), lambda b, p: (b, 0, 0))
    else:
        out_spec = pl.BlockSpec((1, Cout, TP), lambda b, p: (b, 0, p))

    cbytes = jnp.dtype(compute_dtype).itemsize
    obytes = jnp.dtype(out_dtype).itemsize
    vmem_est = (2 * K * TP * cbytes + Cout * K * cbytes + Cout * 3 * 4
                + 2 * Cout * (P_pad if instance_norm else TP) * obytes
                + 2 * Cout * LANE * 4)
    vmem_limit = int(min(int(0.9 * vmem_cap), max(2 * vmem_est, 32 * 1024 * 1024)))
    # TODO(synk): if the resident (Cout, P_pad) block still overflows (v7x,
    # 64 MiB VMEM), switch to a two-pass variant (pass 1: conv + stats straight
    # to HBM, pass 2: tiny per-tile scale/shift sweep).

    cost = pl.CostEstimate(
        flops=2 * N * P_pad * K * Cout,
        transcendentals=0,
        bytes_accessed=(N * K * P_pad * cbytes + Cout * K * cbytes + Cout * 3 * 4
                        + N * Cout * P_pad * obytes
                        + (2 * N * Cout * P_pad * obytes if instance_norm else 0)))

    out = pl.pallas_call(
        kernel,
        out_shape=jax.ShapeDtypeStruct((N, Cout, P_pad), out_dtype),
        grid_spec=pltpu.PrefetchScalarGridSpec(
            num_scalar_prefetch=0,
            grid=(N, n_pt),
            in_specs=[
                pl.BlockSpec((1, K, TP), lambda b, p: (b, 0, p)),     # patches
                pl.BlockSpec((Cout, K), lambda b, p: (0, 0)),         # weight
                pl.BlockSpec((Cout, 3), lambda b, p: (0, 0)),         # bias/gamma/beta
            ],
            out_specs=out_spec,
            scratch_shapes=[pltpu.VMEM((Cout, 1), jnp.float32),
                            pltpu.VMEM((Cout, 1), jnp.float32)],
        ),
        compiler_params=pltpu.CompilerParams(
            dimension_semantics=("parallel", "arbitrary"),
            vmem_limit_bytes=vmem_limit),
        cost_estimate=cost,
    )(patches, w_flat, prm)

    out = out[:, :, :P].reshape(N, Cout, H_out, W_out)
    return out


# --------------------------------------------------------------------------
# Public entry point
# --------------------------------------------------------------------------
def conv_layer_pallas(x, weight, bias, gamma, beta, *, kernel_size, stride,
                      instance_norm=True, eps=1e-5,
                      compute_dtype=jnp.bfloat16, out_dtype=jnp.float32,
                      force_im2col=False):
    """x: (N, Cin, H, W); weight: (Cout, Cin, k, k). Returns (N, Cout, H_out, W_out)."""
    N, Cin, H, W = x.shape
    Cout = weight.shape[0]
    k = kernel_size
    pad = k // 2
    # Reflection pad stays in the wrapper: it is a pure index shuffle that XLA
    # fuses with the dtype cast; the kernel then sees one dense rectangle.
    xp = jnp.pad(x, ((0, 0), (0, 0), (pad, pad), (pad, pad)), mode="reflect")
    vmem_cap = _vmem_capacity_bytes()

    if stride == 1 and not force_im2col:
        Hp, Wp = H + 2 * pad, W + 2 * pad
        L_out = _round_up(Hp * Wp, LANE)
        L_in = L_out + _round_up((k - 1) * (Wp + 1), LANE)
        cbytes = jnp.dtype(compute_dtype).itemsize
        obytes = jnp.dtype(out_dtype).itemsize
        n_ct = 2 if (N == 1 and Cout % 16 == 0) else 1
        Ct = Cout // n_ct
        fused_bytes = (2 * Cin * L_in * cbytes + 2 * Cin * L_out * cbytes
                       + k * k * Cout * Cin * cbytes + Cout * 3 * 4 + L_out * 4
                       + 2 * Ct * L_out * obytes + 2 * Ct * L_out * 4)
        if fused_bytes <= 0.4 * vmem_cap:
            return _conv_layer_fused(xp, weight, bias, gamma, beta, k=k,
                                     instance_norm=instance_norm, eps=eps,
                                     compute_dtype=compute_dtype,
                                     out_dtype=out_dtype, vmem_cap=vmem_cap)
        # TODO(synk): for images too large for one per-batch block, extend the
        # fused path with halo'd row-slab manual DMAs instead of falling back.

    return _conv_layer_im2col(xp, weight, bias, gamma, beta, k=k, stride=stride,
                              instance_norm=instance_norm, eps=eps,
                              compute_dtype=compute_dtype, out_dtype=out_dtype,
                              vmem_cap=vmem_cap)


# --------------------------------------------------------------------------
# Pure-JAX reference (matches the PyTorch module)
# --------------------------------------------------------------------------
def _reference(x, weight, bias, gamma, beta, *, kernel_size, stride,
               instance_norm, eps):
    pad = kernel_size // 2
    xp = jnp.pad(x, ((0, 0), (0, 0), (pad, pad), (pad, pad)), mode="reflect")
    out = lax.conv_general_dilated(
        xp, weight, window_strides=(stride, stride), padding="VALID",
        dimension_numbers=("NCHW", "OIHW", "NCHW"),
        precision=lax.Precision.HIGHEST)
    out = out + bias[None, :, None, None]
    if instance_norm:
        mean = out.mean(axis=(2, 3), keepdims=True)
        var = ((out - mean) ** 2).mean(axis=(2, 3), keepdims=True)
        out = (out - mean) * lax.rsqrt(var + eps)
        out = out * gamma[None, :, None, None] + beta[None, :, None, None]
    return out


if __name__ == "__main__":
    # Shapes consistent with ConvLayer(4, 8, kernel_size=3, stride=1)
    N, Cin, H, W = 2, 4, 16, 16
    Cout, ksize = 8, 3

    key = jax.random.PRNGKey(0)
    kx, kw, kb = jax.random.split(key, 3)
    x = jax.random.normal(kx, (N, Cin, H, W), dtype=jnp.float32)
    fan_in = Cin * ksize * ksize
    weight = jax.random.normal(kw, (Cout, Cin, ksize, ksize),
                               dtype=jnp.float32) * (1.0 / fan_in) ** 0.5
    bias = jax.random.normal(kb, (Cout,), dtype=jnp.float32) * 0.05
    gamma = jnp.ones((Cout,), dtype=jnp.float32)   # InstanceNorm2d affine init
    beta = jnp.zeros((Cout,), dtype=jnp.float32)

    ref1 = _reference(x, weight, bias, gamma, beta, kernel_size=ksize, stride=1,
                      instance_norm=True, eps=1e-5)

    # 1) Fused path, f32 compute (tight check)
    out = conv_layer_pallas(x, weight, bias, gamma, beta, kernel_size=ksize,
                            stride=1, instance_norm=True,
                            compute_dtype=jnp.float32)
    jax.block_until_ready(out)
    assert out.shape == (N, Cout, H, W), out.shape
    err = float(jnp.max(jnp.abs(out - ref1)))
    assert err < 2e-2, ("fused f32", err)

    # 2) Fused path, default bf16 compute (loose tolerance; validates the
    #    default path per the correctness review)
    out_bf = conv_layer_pallas(x, weight, bias, gamma, beta, kernel_size=ksize,
                               stride=1, instance_norm=True)
    jax.block_until_ready(out_bf)
    err = float(jnp.max(jnp.abs(out_bf.astype(jnp.float32) - ref1)))
    assert err < 2e-1, ("fused bf16", err)

    # 3) im2col fallback exercised via stride=2 (f32)
    ref2 = _reference(x, weight, bias, gamma, beta, kernel_size=ksize, stride=2,
                      instance_norm=True, eps=1e-5)
    out2 = conv_layer_pallas(x, weight, bias, gamma, beta, kernel_size=ksize,
                             stride=2, instance_norm=True,
                             compute_dtype=jnp.float32)
    jax.block_until_ready(out2)
    assert out2.shape == ref2.shape, out2.shape
    err = float(jnp.max(jnp.abs(out2 - ref2)))
    assert err < 2e-2, ("im2col stride2 f32", err)

    # 4) im2col path forced at stride=1 (covers resident block + chunked finalize)
    out3 = conv_layer_pallas(x, weight, bias, gamma, beta, kernel_size=ksize,
                             stride=1, instance_norm=True,
                             compute_dtype=jnp.float32, force_im2col=True)
    jax.block_until_ready(out3)
    err = float(jnp.max(jnp.abs(out3 - ref1)))
    assert err < 2e-2, ("im2col stride1 f32", err)

    print("KERNEL_OK")
</pallas_src>

<mosaic_0001>
module attributes {stable_mosaic.version = 11 : i64} {
  func.func @_fused_kernel(%arg0: i32, %arg1: i32, %arg2: memref<1x4x512xf32, #tpu.memory_space<vmem>>, %arg3: memref<9x8x4xf32, #tpu.memory_space<vmem>>, %arg4: memref<8x3xf32, #tpu.memory_space<vmem>>, %arg5: memref<1x384xf32, #tpu.memory_space<vmem>>, %arg6: memref<1x8x384xf32, #tpu.memory_space<vmem>>) attributes {dimension_semantics = [#tpu.dimension_semantics<parallel>, #tpu.dimension_semantics<parallel>], iteration_bounds = array<i64: 2, 1>, scalar_prefetch = 0 : i64, scratch_operands = 0 : i64, tpu.core_type = #tpu.core_type<tc>, window_params = [{transform_indices = @transform_0, window_bounds = array<i64: 1, 4, 512>}, {transform_indices = @transform_1, window_bounds = array<i64: 9, 8, 4>}, {transform_indices = @transform_2, window_bounds = array<i64: 8, 3>}, {pipeline_mode = #tpu.pipeline_mode<synchronous>, transform_indices = @transform_3, window_bounds = array<i64: 1, 384>}, {transform_indices = @transform_4, window_bounds = array<i64: 1, 8, 384>}]} {
    %c0 = arith.constant 0 : index
    %c0_0 = arith.constant 0 : index
    %c0_1 = arith.constant 0 : index
    %0 = vector.load %arg2[%c0, %c0_0, %c0_1] : memref<1x4x512xf32, #tpu.memory_space<vmem>>, vector<1x4x384xf32>
    %1 = vector.shape_cast %0 : vector<1x4x384xf32> to vector<4x384xf32>
    %c0_2 = arith.constant 0 : index
    %c0_3 = arith.constant 0 : index
    %c0_4 = arith.constant 0 : index
    %2 = vector.load %arg3[%c0_2, %c0_3, %c0_4] : memref<9x8x4xf32, #tpu.memory_space<vmem>>, vector<1x8x4xf32>
    %3 = vector.shape_cast %2 : vector<1x8x4xf32> to vector<8x4xf32>
    %cst = arith.constant dense<0.000000e+00> : vector<8x384xf32>
    %4 = tpu.matmul %3, %1, %cst {dimension_numbers = #tpu.dot_dimension_numbers<[1], [0], [0], [1], [0, 0, 1, 1], [], []>} : vector<8x4xf32>, vector<4x384xf32>, vector<8x384xf32> -> vector<8x384xf32>
    %c0_5 = arith.constant 0 : index
    %c0_6 = arith.constant 0 : index
    %c1 = arith.constant 1 : index
    %5 = vector.load %arg2[%c0_5, %c0_6, %c1] : memref<1x4x512xf32, #tpu.memory_space<vmem>>, vector<1x4x384xf32>
    %6 = vector.shape_cast %5 : vector<1x4x384xf32> to vector<4x384xf32>
    %c1_7 = arith.constant 1 : index
    %c0_8 = arith.constant 0 : index
    %c0_9 = arith.constant 0 : index
    %7 = vector.load %arg3[%c1_7, %c0_8, %c0_9] : memref<9x8x4xf32, #tpu.memory_space<vmem>>, vector<1x8x4xf32>
    %8 = vector.shape_cast %7 : vector<1x8x4xf32> to vector<8x4xf32>
    %cst_10 = arith.constant dense<0.000000e+00> : vector<8x384xf32>
    %9 = tpu.matmul %8, %6, %cst_10 {dimension_numbers = #tpu.dot_dimension_numbers<[1], [0], [0], [1], [0, 0, 1, 1], [], []>} : vector<8x4xf32>, vector<4x384xf32>, vector<8x384xf32> -> vector<8x384xf32>
    %10 = arith.addf %4, %9 : vector<8x384xf32>
    %c0_11 = arith.constant 0 : index
    %c0_12 = arith.constant 0 : index
    %c2 = arith.constant 2 : index
    %11 = vector.load %arg2[%c0_11, %c0_12, %c2] : memref<1x4x512xf32, #tpu.memory_space<vmem>>, vector<1x4x384xf32>
    %12 = vector.shape_cast %11 : vector<1x4x384xf32> to vector<4x384xf32>
    %c2_13 = arith.constant 2 : index
    %c0_14 = arith.constant 0 : index
    %c0_15 = arith.constant 0 : index
    %13 = vector.load %arg3[%c2_13, %c0_14, %c0_15] : memref<9x8x4xf32, #tpu.memory_space<vmem>>, vector<1x8x4xf32>
    %14 = vector.shape_cast %13 : vector<1x8x4xf32> to vector<8x4xf32>
    %cst_16 = arith.constant dense<0.000000e+00> : vector<8x384xf32>
    %15 = tpu.matmul %14, %12, %cst_16 {dimension_numbers = #tpu.dot_dimension_numbers<[1], [0], [0], [1], [0, 0, 1, 1], [], []>} : vector<8x4xf32>, vector<4x384xf32>, vector<8x384xf32> -> vector<8x384xf32>
    %16 = arith.addf %10, %15 : vector<8x384xf32>
    %c0_17 = arith.constant 0 : index
    %c0_18 = arith.constant 0 : index
    %c18 = arith.constant 18 : index
    %17 = vector.load %arg2[%c0_17, %c0_18, %c18] : memref<1x4x512xf32, #tpu.memory_space<vmem>>, vector<1x4x384xf32>
    %18 = vector.shape_cast %17 : vector<1x4x384xf32> to vector<4x384xf32>
    %c3 = arith.constant 3 : index
    %c0_19 = arith.constant 0 : index
    %c0_20 = arith.constant 0 : index
    %19 = vector.load %arg3[%c3, %c0_19, %c0_20] : memref<9x8x4xf32, #tpu.memory_space<vmem>>, vector<1x8x4xf32>
    %20 = vector.shape_cast %19 : vector<1x8x4xf32> to vector<8x4xf32>
    %cst_21 = arith.constant dense<0.000000e+00> : vector<8x384xf32>
    %21 = tpu.matmul %20, %18, %cst_21 {dimension_numbers = #tpu.dot_dimension_numbers<[1], [0], [0], [1], [0, 0, 1, 1], [], []>} : vector<8x4xf32>, vector<4x384xf32>, vector<8x384xf32> -> vector<8x384xf32>
    %22 = arith.addf %16, %21 : vector<8x384xf32>
    %c0_22 = arith.constant 0 : index
    %c0_23 = arith.constant 0 : index
    %c19 = arith.constant 19 : index
    %23 = vector.load %arg2[%c0_22, %c0_23, %c19] : memref<1x4x512xf32, #tpu.memory_space<vmem>>, vector<1x4x384xf32>
    %24 = vector.shape_cast %23 : vector<1x4x384xf32> to vector<4x384xf32>
    %c4 = arith.constant 4 : index
    %c0_24 = arith.constant 0 : index
    %c0_25 = arith.constant 0 : index
    %25 = vector.load %arg3[%c4, %c0_24, %c0_25] : memref<9x8x4xf32, #tpu.memory_space<vmem>>, vector<1x8x4xf32>
    %26 = vector.shape_cast %25 : vector<1x8x4xf32> to vector<8x4xf32>
    %cst_26 = arith.constant dense<0.000000e+00> : vector<8x384xf32>
    %27 = tpu.matmul %26, %24, %cst_26 {dimension_numbers = #tpu.dot_dimension_numbers<[1], [0], [0], [1], [0, 0, 1, 1], [], []>} : vector<8x4xf32>, vector<4x384xf32>, vector<8x384xf32> -> vector<8x384xf32>
    %28 = arith.addf %22, %27 : vector<8x384xf32>
    %c0_27 = arith.constant 0 : index
    %c0_28 = arith.constant 0 : index
    %c20 = arith.constant 20 : index
    %29 = vector.load %arg2[%c0_27, %c0_28, %c20] : memref<1x4x512xf32, #tpu.memory_space<vmem>>, vector<1x4x384xf32>
    %30 = vector.shape_cast %29 : vector<1x4x384xf32> to vector<4x384xf32>
    %c5 = arith.constant 5 : index
    %c0_29 = arith.constant 0 : index
    %c0_30 = arith.constant 0 : index
    %31 = vector.load %arg3[%c5, %c0_29, %c0_30] : memref<9x8x4xf32, #tpu.memory_space<vmem>>, vector<1x8x4xf32>
    %32 = vector.shape_cast %31 : vector<1x8x4xf32> to vector<8x4xf32>
    %cst_31 = arith.constant dense<0.000000e+00> : vector<8x384xf32>
    %33 = tpu.matmul %32, %30, %cst_31 {dimension_numbers = #tpu.dot_dimension_numbers<[1], [0], [0], [1], [0, 0, 1, 1], [], []>} : vector<8x4xf32>, vector<4x384xf32>, vector<8x384xf32> -> vector<8x384xf32>
    %34 = arith.addf %28, %33 : vector<8x384xf32>
    %c0_32 = arith.constant 0 : index
    %c0_33 = arith.constant 0 : index
    %c36 = arith.constant 36 : index
    %35 = vector.load %arg2[%c0_32, %c0_33, %c36] : memref<1x4x512xf32, #tpu.memory_space<vmem>>, vector<1x4x384xf32>
    %36 = vector.shape_cast %35 : vector<1x4x384xf32> to vector<4x384xf32>
    %c6 = arith.constant 6 : index
    %c0_34 = arith.constant 0 : index
    %c0_35 = arith.constant 0 : index
    %37 = vector.load %arg3[%c6, %c0_34, %c0_35] : memref<9x8x4xf32, #tpu.memory_space<vmem>>, vector<1x8x4xf32>
    %38 = vector.shape_cast %37 : vector<1x8x4xf32> to vector<8x4xf32>
    %cst_36 = arith.constant dense<0.000000e+00> : vector<8x384xf32>
    %39 = tpu.matmul %38, %36, %cst_36 {dimension_numbers = #tpu.dot_dimension_numbers<[1], [0], [0], [1], [0, 0, 1, 1], [], []>} : vector<8x4xf32>, vector<4x384xf32>, vector<8x384xf32> -> vector<8x384xf32>
    %40 = arith.addf %34, %39 : vector<8x384xf32>
    %c0_37 = arith.constant 0 : index
    %c0_38 = arith.constant 0 : index
    %c37 = arith.constant 37 : index
    %41 = vector.load %arg2[%c0_37, %c0_38, %c37] : memref<1x4x512xf32, #tpu.memory_space<vmem>>, vector<1x4x384xf32>
    %42 = vector.shape_cast %41 : vector<1x4x384xf32> to vector<4x384xf32>
    %c7 = arith.constant 7 : index
    %c0_39 = arith.constant 0 : index
    %c0_40 = arith.constant 0 : index
    %43 = vector.load %arg3[%c7, %c0_39, %c0_40] : memref<9x8x4xf32, #tpu.memory_space<vmem>>, vector<1x8x4xf32>
    %44 = vector.shape_cast %43 : vector<1x8x4xf32> to vector<8x4xf32>
    %cst_41 = arith.constant dense<0.000000e+00> : vector<8x384xf32>
    %45 = tpu.matmul %44, %42, %cst_41 {dimension_numbers = #tpu.dot_dimension_numbers<[1], [0], [0], [1], [0, 0, 1, 1], [], []>} : vector<8x4xf32>, vector<4x384xf32>, vector<8x384xf32> -> vector<8x384xf32>
    %46 = arith.addf %40, %45 : vector<8x384xf32>
    %c0_42 = arith.constant 0 : index
    %c0_43 = arith.constant 0 : index
    %c38 = arith.constant 38 : index
    %47 = vector.load %arg2[%c0_42, %c0_43, %c38] : memref<1x4x512xf32, #tpu.memory_space<vmem>>, vector<1x4x384xf32>
    %48 = vector.shape_cast %47 : vector<1x4x384xf32> to vector<4x384xf32>
    %c8 = arith.constant 8 : index
    %c0_44 = arith.constant 0 : index
    %c0_45 = arith.constant 0 : index
    %49 = vector.load %arg3[%c8, %c0_44, %c0_45] : memref<9x8x4xf32, #tpu.memory_space<vmem>>, vector<1x8x4xf32>
    %50 = vector.shape_cast %49 : vector<1x8x4xf32> to vector<8x4xf32>
    %cst_46 = arith.constant dense<0.000000e+00> : vector<8x384xf32>
    %51 = tpu.matmul %50, %48, %cst_46 {dimension_numbers = #tpu.dot_dimension_numbers<[1], [0], [0], [1], [0, 0, 1, 1], [], []>} : vector<8x4xf32>, vector<4x384xf32>, vector<8x384xf32> -> vector<8x384xf32>
    %52 = arith.addf %46, %51 : vector<8x384xf32>
    %c0_47 = arith.constant 0 : index
    %c0_48 = arith.constant 0 : index
    %53 = vector.load %arg5[%c0_47, %c0_48] : memref<1x384xf32, #tpu.memory_space<vmem>>, vector<1x384xf32>
    %54 = vector.broadcast %53 : vector<1x384xf32> to vector<8x384xf32>
    %55 = arith.mulf %52, %54 : vector<8x384xf32>
    %cst_49 = arith.constant dense<0.000000e+00> : vector<8xf32>
    %56 = vector.multi_reduction <add>, %55, %cst_49 [1] : vector<8x384xf32> to vector<8xf32>
    %57 = vector.shape_cast %56 : vector<8xf32> to vector<8x1xf32>
    %cst_50 = arith.constant 3.906250e-03 : f32
    %58 = vector.broadcast %cst_50 : f32 to vector<8x1xf32>
    %59 = arith.mulf %57, %58 : vector<8x1xf32>
    %60 = arith.mulf %55, %52 : vector<8x384xf32>
    %cst_51 = arith.constant dense<0.000000e+00> : vector<8xf32>
    %61 = vector.multi_reduction <add>, %60, %cst_51 [1] : vector<8x384xf32> to vector<8xf32>
    %62 = vector.shape_cast %61 : vector<8xf32> to vector<8x1xf32>
    %cst_52 = arith.constant 3.906250e-03 : f32
    %63 = vector.broadcast %cst_52 : f32 to vector<8x1xf32>
    %64 = arith.mulf %62, %63 : vector<8x1xf32>
    %65 = arith.mulf %59, %59 : vector<8x1xf32>
    %66 = arith.subf %64, %65 : vector<8x1xf32>
    %c0_53 = arith.constant 0 : index
    %c1_54 = arith.constant 1 : index
    %67 = vector.load %arg4[%c0_53, %c1_54] : memref<8x3xf32, #tpu.memory_space<vmem>>, vector<8x1xf32>
    %cst_55 = arith.constant 9.99999974E-6 : f32
    %68 = vector.broadcast %cst_55 : f32 to vector<8x1xf32>
    %69 = arith.addf %66, %68 : vector<8x1xf32>
    %70 = math.rsqrt %69 : vector<8x1xf32>
    %71 = arith.mulf %67, %70 : vector<8x1xf32>
    %c0_56 = arith.constant 0 : index
    %c2_57 = arith.constant 2 : index
    %72 = vector.load %arg4[%c0_56, %c2_57] : memref<8x3xf32, #tpu.memory_space<vmem>>, vector<8x1xf32>
    %73 = arith.mulf %59, %71 : vector<8x1xf32>
    %74 = arith.subf %72, %73 : vector<8x1xf32>
    %75 = vector.broadcast %71 : vector<8x1xf32> to vector<8x384xf32>
    %76 = arith.mulf %52, %75 : vector<8x384xf32>
    %77 = vector.broadcast %74 : vector<8x1xf32> to vector<8x384xf32>
    %78 = arith.addf %76, %77 : vector<8x384xf32>
    %c0_58 = arith.constant 0 : index
    %c0_59 = arith.constant 0 : index
    %c0_60 = arith.constant 0 : index
    %79 = vector.load %arg6[%c0_58, %c0_59, %c0_60] : memref<1x8x384xf32, #tpu.memory_space<vmem>>, vector<1x8x384xf32>
    %80 = vector.shape_cast %79 : vector<1x8x384xf32> to vector<8x384xf32>
    %81 = vector.shape_cast %78 : vector<8x384xf32> to vector<1x8x384xf32>
    tpu.vector_store %arg6[%c0_58, %c0_59, %c0_60], %81 {strides = array<i32>} : memref<1x8x384xf32, #tpu.memory_space<vmem>>, vector<1x8x384xf32>,
    return
  }
  func.func @transform_0(%arg0: i32, %arg1: i32) -> (i32, i32, i32) {
    %c0_i32 = arith.constant 0 : i32
    %c0_i32_0 = arith.constant 0 : i32
    %c0_i32_1 = arith.constant 0 : i32
    return %arg0, %c0_i32, %c0_i32_0 : i32, i32, i32
  }
  func.func @transform_1(%arg0: i32, %arg1: i32) -> (i32, i32, i32) {
    %c0_i32 = arith.constant 0 : i32
    %c0_i32_0 = arith.constant 0 : i32
    %c0_i32_1 = arith.constant 0 : i32
    return %c0_i32, %arg1, %c0_i32_0 : i32, i32, i32
  }
  func.func @transform_2(%arg0: i32, %arg1: i32) -> (i32, i32) {
    %c0_i32 = arith.constant 0 : i32
    %c0_i32_0 = arith.constant 0 : i32
    return %arg1, %c0_i32 : i32, i32
  }
  func.func @transform_3(%arg0: i32, %arg1: i32) -> (i32, i32) {
    %c0_i32 = arith.constant 0 : i32
    %c0_i32_0 = arith.constant 0 : i32
    %c0_i32_1 = arith.constant 0 : i32
    return %c0_i32, %c0_i32_0 : i32, i32
  }
  func.func @transform_4(%arg0: i32, %arg1: i32) -> (i32, i32, i32) {
    %c0_i32 = arith.constant 0 : i32
    %c0_i32_0 = arith.constant 0 : i32
    return %arg0, %arg1, %c0_i32 : i32, i32, i32
  }
}

</mosaic_0001>

<bundles_post_ra>
// kernel: tpu_custom_call.1
= control target key start
LH: loop header
LB: loop body
LE: loop exit
PB: predicated region body
PF: predicated region fallthrough
CT: control target
= control target key end

     0   :  { %9 = vsyncpa [#allocation3], 0  ;;  %s2553_s0 = inlined_call_operand.vmem [shape: f32[2,4,512], index: 0, kind: input, shape index: {}]   ;;  %s2554_s1 = inlined_call_operand.vmem [shape: f32[9,8,4], index: 1, kind: input, shape index: {}]   ;;  %s2555_s2 = inlined_call_operand.vmem [shape: f32[8,3], index: 2, kind: input, shape index: {}]   ;;  %s2556_s3 = inlined_call_operand.vmem [shape: f32[1,384], index: 3, kind: input, shape index: {}]   ;;  %s2557_s4 = inlined_call_operand.hbm [shape: f32[2,8,384], index: 4, kind: output, shape index: {}]  }
   0x1   :  { %11 = vsyncpa [#allocation3 + $0x1], 0  ;;  %s2286_s15 = smov 0   ;;  %s2288_s16 = smov 0  }
   0x2   :  { %s2290_s17 = smov 0   ;;  %s2292_s18 = smov 0  }
   0x3   :  { %s2294_s19 = smov 0   ;;  %s2296_s20 = smov 0  }
   0x4 LB: > { %s1964_s21 = sadd.s32 4294967295, %s2245_s20   ;;  %s1965_s22 = sadd.s32 4294967294, %s2245_s20   ;;  %s2245_s20 = sphi %s2296_s20, %s17_s20   ;;  %s2241_s19 = sphi %s2294_s19, %s2564_s19   ;;  %s2237_s18 = sphi %s2292_s18, %s2563_s18   ;;  %s2233_s17 = sphi %s2290_s17, %s2562_s17   ;;  %s2229_s16 = sphi %s2288_s16, %s2561_s16   ;;  %s2225_s15 = sphi %s2286_s15, %s2560_s15  }
   0x5   : > { %s29_s23 = sadd.s32 1, %s2241_s19  ;;  %s137_s24 = sadd.s32 1, %s2233_s17 }
   0x6   : > { %p31_p0 = scmp.ge.s32.totalorder %s29_s23, 2  ;;  %p147_p1 = scmp.ne.s32.totalorder %s2233_s17, %s2229_s16 }
   0x7   : > { %p148_p2 = scmp.eq.s32.totalorder %s1964_s21, 1  ;;  %p153_p3 = scmp.ne.s32.totalorder %s2229_s16, %s2225_s15 }
   0x8   : > { %s2566_s23 = smov (%p31_p0, %s29_s23), 0  ;;  %p154_p5 = scmp.eq.s32.totalorder %s1965_s22, 1 }
   0x9   : > { %p2326_p4 = por %p148_p2, %p147_p1  ;;  %s132_s26 = ssub.s32 %s2241_s19, %s2566_s23 }
   0xa   : > { %p1970_p6 = scmp.ge.s32.totalorder %s2245_s20, 1  ;;  %p135_p7 = scmp.eq.s32.totalorder %s132_s26, 0 }
   0xb   : > { %p2333_p8 = por %p154_p5, %p153_p3  ;;  %p197_p9 = scmp.lt.s32.totalorder %s2245_s20, 3 }
   0xc   : > { %s2339_s28 = scalar_select %p135_p7, %s2233_s17, %s137_s24  }
   0xd   : > { %p198_p10 = pnand %p1970_p6, %p197_p9 }
   0xe   : > { %p231_p11 = scmp.lt.s32.totalorder (!%p198_p10), %s2237_s18, 1  ;;  %s2249_s8 = smov (!%p198_p10), 127  }
   0xf   : > { %201 = sbr.rel (%p198_p10) target bundleno = 826 (0x33a), region = 36  ;;  %s2250_s9 = smov (!%p198_p10), 126  }
  0x10   : > { %s2251_s10 = smov (!%p198_p10), 110   ;;  %s2252_s11 = smov (!%p198_p10), 109  }
  0x11   : > { %s2253_s12 = smov (!%p198_p10), 108   ;;  %s2254_s13 = smov (!%p198_p10), 92  }
  0x12   : > { %s2255_s14 = smov (!%p198_p10), 91   ;;  %s2256_s21 = smov (!%p198_p10), 90  }
  0x13   : > { %s2259_s6 = smov (!%p198_p10), 1   ;;  %s2260_s22 = smov (!%p198_p10), [#allocation2]  }
  0x14   : > { %v2247_v0 = vmov 0.0   ;;  %s232_s29 = scalar_select %p231_p11, %s2237_s18, 1  ;;  %vm2248_vm0 = vmmov 0   ;;  %vm263_vm1 = vcmask 1039360   ;;  %vm271_vm2 = vcmask 1043456   ;;  %v1973_v11 = vld [vmem:[%s2554_s1 + $0x8] sm:$0xff] }
  0x15   : > { %342 = vmatprep.mubr.f32.mxu0 %v2247_v0  ;;  %2048 = vmatprep.subr.mxu1 %v2247_v0  ;;  %vm267_vm3 = vcmask 31744   ;;  %vm588_vm4 = vcmask 1031168   ;;  %v246_v16 = vld [vmem:[%s2554_s1] sm:$0xff]  ;;  %v1984_v21 = vld [vmem:[%s2554_s1 + $0x10] sm:$0xff]  ;;  %vm761_vm5 = vcmask 900096   ;;  %v1990_v28 = vld [vmem:[%s2554_s1 + $0x18] sm:$0xff] }
  0x16   : > { %s2029_s30 = sshll.u32 %s232_s29, 4  ;;  %2050 = vmatprep.mubr.msk.f32.mxu1 %vm2248_vm0, %v2247_v0  ;;  %vm934_vm6 = vcmask 891904   ;;  %v1996_v36 = vld [vmem:[%s2554_s1 + $0x20] sm:$0xff]  ;;  %vm1107_vm7 = vcmask 883712   ;;  %v2002_v44 = vld [vmem:[%s2554_s1 + $0x28] sm:$0xff]  ;;  %vm1280_vm8 = vcmask 752640  }
  0x17   : > { %s2348_s7 = scalar_lea.vmem %s2553_s0, %s2029_s30  ;;  %v2008_v52 = vld [vmem:[%s2554_s1 + $0x30] sm:$0xff]  ;;  %vm1453_vm9 = vcmask 744448   ;;  %v2014_v60 = vld [vmem:[%s2554_s1 + $0x38] sm:$0xff]  ;;  %vm1626_vm10 = vcmask 736256   ;;  %s2173_s24 = sshll.u32 %s2260_s22, 4  ;;  %s2174_s24 = int_to_ptr.vmem [resolvable:$false] %s2173_s24 }
  0x18   : > { %v248_v1 = vld [vmem:[%s2348_s7 + $0x8] sm:$0xff]  ;;  %v2352_v2 = vld [vmem:[%s2348_s7] sm:$0xff]  ;;  %s2175_s26 = scalar_lea.vmem %s2174_s24, 768 }
  0x19   : > { %259 = vrot.lane.b32.xlu0 %v248_v1, %s2249_s8  ;;  %255 = vrot.lane.b32.xlu1 %v2352_v2, %s2249_s8  ;;  %v253_v3 = vcombine.high %v2352_v2, %v2352_v2  ;;  %v254_v4 = vcombine.high %v248_v1, %v248_v1  ;;  %v245_v17 = vld [vmem:[%s2348_s7 + $0x8] sm:$0xf]  ;;  %s228_s7 = sand.u32 1, %s2229_s16  }
  0x1d   : > { %584 = vrot.lane.b32.xlu1 %v248_v1, %s2250_s9  ;;  %257 = vrot.lane.b32.xlu0 %v253_v3, %s2249_s8 }
  0x21   : > { %261 = vrot.lane.b32.xlu1 %v254_v4, %s2249_s8  ;;  %582 = vrot.lane.b32.xlu0 %v253_v3, %s2250_s9  ;;  %s2093_s8 = smul.u32 24, %s228_s7 }
  0x25   : > { %755 = vrot.lane.b32.xlu1 %v253_v3, %s2251_s10  ;;  %580 = vrot.lane.b32.xlu0 %v2352_v2, %s2250_s9 }
  0x29   : > { %586 = vrot.lane.b32.xlu1 %v254_v4, %s2250_s9  ;;  %757 = vrot.lane.b32.xlu0 %v248_v1, %s2251_s10  ;;  %s2094_s9 = smul.u32 384, %s2237_s18  ;;  %s1848_s18 = scalar_lea.sflag [#allocation3], %s228_s7 }
  0x2d   : > { %928 = vrot.lane.b32.xlu1 %v253_v3, %s2252_s11  ;;  %753 = vrot.lane.b32.xlu0 %v2352_v2, %s2251_s10 }
  0x31   : > { %759 = vrot.lane.b32.xlu1 %v254_v4, %s2251_s10  ;;  %930 = vrot.lane.b32.xlu0 %v248_v1, %s2252_s11  ;;  %s230_s10 = scalar_lea.vmem [#allocation2], %s2093_s8 }
  0x35   : > { %1101 = vrot.lane.b32.xlu1 %v253_v3, %s2253_s12  ;;  %926 = vrot.lane.b32.xlu0 %v2352_v2, %s2252_s11 }
  0x39   : > { %932 = vrot.lane.b32.xlu1 %v254_v4, %s2252_s11  ;;  %1103 = vrot.lane.b32.xlu0 %v248_v1, %s2253_s12  ;;  %s1864_s11 = sshll.u32 %s230_s10, 4  ;;  %s2509_s11 = int_to_ptr.vmem [resolvable:$true] %s1864_s11 }
  0x3a   : > { %p2176_p1 = scmp.lt.s32.totalorder %s2509_s11, %s2174_s24 }
  0x3d   : > { %1274 = vrot.lane.b32.xlu1 %v253_v3, %s2254_s13  ;;  %1099 = vrot.lane.b32.xlu0 %v2352_v2, %s2253_s12 }
  0x41   : > { %1105 = vrot.lane.b32.xlu1 %v254_v4, %s2253_s12  ;;  %1276 = vrot.lane.b32.xlu0 %v248_v1, %s2254_s13 }
  0x45   : > { %1447 = vrot.lane.b32.xlu1 %v253_v3, %s2255_s14  ;;  %1272 = vrot.lane.b32.xlu0 %v2352_v2, %s2254_s13 }
  0x49   : > { %1278 = vrot.lane.b32.xlu1 %v254_v4, %s2254_s13  ;;  %1449 = vrot.lane.b32.xlu0 %v248_v1, %s2255_s14 }
  0x4d   : > { %1620 = vrot.lane.b32.xlu1 %v253_v3, %s2256_s21  ;;  %1445 = vrot.lane.b32.xlu0 %v2352_v2, %s2255_s14 }
  0x51   : > { %1451 = vrot.lane.b32.xlu1 %v254_v4, %s2255_s14  ;;  %1622 = vrot.lane.b32.xlu0 %v248_v1, %s2256_s21  ;;  %s2507_s14 = scalar_lea.hbm %s2557_s4, %s2094_s9 }
  0x55   : > { %1624 = vrot.lane.b32.xlu1 %v254_v4, %s2256_s21  ;;  %1618 = vrot.lane.b32.xlu0 %v2352_v2, %s2256_s21  ;;  %s2169_s21 = scalar_lea.vmem %s2509_s11, 384 }
  0x56   : > { %p2170_p12 = scmp.ne.s32.totalorder %s2509_s11, %s2169_s21  ;;  %p2177_p2 = scmp.lt.s32.totalorder %s2175_s26, %s2169_s21 }
  0x58   : > { %p2171_p13 = pnand %p2170_p12, %p2326_p4  ;;  %p2178_p3 = por %p2177_p2, %p2176_p1 }
  0x5a   : > { %p2172_p0 = pneg %p2171_p13 }
  0x5c   : > { %p2179_p5 = pnand %p2178_p3, %p2172_p0 }
  0x8b   : > { %v260_v5 = vpop.permute.xlu0 %259  ;;  %v256_v6 = vpop.permute.xlu1 %255 }
  0x8f   : > { %v585_v7 = vpop.permute.xlu1 %584  ;;  %v258_v8 = vpop.permute.xlu0 %257 }
  0x90   : > { %v265_v9 = vsel %vm263_vm1, %v258_v8, %v260_v5  ;;  %v264_v10 = vsel %vm263_vm1, %v256_v6, %v258_v8 }
  0x91   : > { %1974 = vmatprep.subr.msk.mxu0 %vm271_vm2, %v265_v9 }
  0x92   : > { %1975 = vmatpush1.msk.msra.mxu0 %vm271_vm2, %v264_v10 }
  0x93   : > { %v262_v12 = vpop.permute.xlu1 %261  ;;  %v583_v13 = vpop.permute.xlu0 %582  ;;  %1979 = vmatprep.subr.msk.mxu0 %vm271_vm2, %v253_v3  ;;  %1976 = vmatmul.mubr.msk.f32.vlgmr.msra.gmra.mxu0 %vm267_vm3, %v1973_v11 }
  0x94   : > { %v590_v14 = vsel %vm588_vm4, %v583_v13, %v585_v7  ;;  %1980 = vmatpush1.msk.msra.mxu0 %vm271_vm2, %v2352_v2  ;;  %v266_v15 = vsel %vm263_vm1, %v260_v5, %v262_v12  ;;  %495 = vmatprep.mubr.f32.mxu0 %v2247_v0  ;;  %v2020_v5 = vld [vmem:[%s2554_s1 + $0x40] sm:$0xff] }
  0x95   : > { %2049 = vmatpush3.msk.msra.mxu1 %vm271_vm2, %v266_v15  ;;  %1985 = vmatprep.subr.msk.mxu0 %vm271_vm2, %v590_v14 }
  0x96   : > { %2051 = vmatmul.mubr.msk.f32.vlgmr.msra.gmra.mxu1 %vm267_vm3, %v1973_v11  ;;  %2053 = vmatprep.subr.mxu1 %v2247_v0 }
  0x97   : > { %v756_v18 = vpop.permute.xlu1 %755  ;;  %v581_v19 = vpop.permute.xlu0 %580  ;;  %1981 = vmatmul.mubr.msk.f32.vlgmr.msra.gmra.mxu0 %vm267_vm3, %v246_v16  ;;  %2054 = vmatpush3.msk.msra.mxu1 %vm271_vm2, %v245_v17 }
  0x98   : > { %v589_v20 = vsel %vm588_vm4, %v581_v19, %v583_v13  ;;  %2055 = vmatprep.mubr.msk.f32.mxu1 %vm2248_vm0, %v2247_v0  ;;  %2058 = vmatprep.subr.mxu1 %v2247_v0 }
  0x99   : > { %1986 = vmatpush1.msk.msra.mxu0 %vm271_vm2, %v589_v20  ;;  %665 = vmatprep.mubr.f32.mxu0 %v2247_v0 }
  0x9a   : > { %2056 = vmatmul.mubr.msk.f32.vlgmr.msra.gmra.mxu1 %vm267_vm3, %v246_v16 }
  0x9b   : > { %v587_v22 = vpop.permute.xlu1 %586  ;;  %v758_v23 = vpop.permute.xlu0 %757  ;;  %1987 = vmatmul.mubr.msk.f32.vlgmr.msra.gmra.mxu0 %vm267_vm3, %v1984_v21  ;;  %2060 = vmatprep.mubr.msk.f32.mxu1 %vm2248_vm0, %v2247_v0 }
  0x9c   : > { %v591_v24 = vsel %vm588_vm4, %v585_v7, %v587_v22  ;;  %v763_v25 = vsel %vm761_vm5, %v756_v18, %v758_v23  ;;  %838 = vmatprep.mubr.f32.mxu0 %v2247_v0 }
  0x9d   : > { %2059 = vmatpush3.msk.msra.mxu1 %vm271_vm2, %v591_v24  ;;  %1991 = vmatprep.subr.msk.mxu0 %vm271_vm2, %v763_v25 }
  0x9e   : > { %2063 = vmatprep.subr.mxu1 %v2247_v0  ;;  %2061 = vmatmul.mubr.msk.f32.vlgmr.msra.gmra.mxu1 %vm267_vm3, %v1984_v21 }
  0x9f   : > { %v929_v26 = vpop.permute.xlu1 %928  ;;  %v754_v27 = vpop.permute.xlu0 %753  ;;  %2065 = vmatprep.mubr.msk.f32.mxu1 %vm2248_vm0, %v2247_v0 }
  0xa0   : > { %v762_v29 = vsel %vm761_vm5, %v754_v27, %v756_v18 }
  0xa1   : > { %1992 = vmatpush1.msk.msra.mxu0 %vm271_vm2, %v762_v29 }
  0xa2   : > { %1993 = vmatmul.mubr.msk.f32.vlgmr.msra.gmra.mxu0 %vm267_vm3, %v1990_v28 }
  0xa3   : > { %v760_v30 = vpop.permute.xlu1 %759  ;;  %v931_v31 = vpop.permute.xlu0 %930  ;;  %1011 = vmatprep.mubr.f32.mxu0 %v2247_v0 }
  0xa4   : > { %v764_v32 = vsel %vm761_vm5, %v758_v23, %v760_v30  ;;  %v936_v33 = vsel %vm934_vm6, %v929_v26, %v931_v31 }
  0xa5   : > { %2064 = vmatpush3.msk.msra.mxu1 %vm271_vm2, %v764_v32  ;;  %1997 = vmatprep.subr.msk.mxu0 %vm271_vm2, %v936_v33 }
  0xa6   : > { %2068 = vmatprep.subr.mxu1 %v2247_v0  ;;  %2066 = vmatmul.mubr.msk.f32.vlgmr.msra.gmra.mxu1 %vm267_vm3, %v1990_v28 }
  0xa7   : > { %v1102_v34 = vpop.permute.xlu1 %1101  ;;  %v927_v35 = vpop.permute.xlu0 %926  ;;  %2070 = vmatprep.mubr.msk.f32.mxu1 %vm2248_vm0, %v2247_v0 }
  0xa8   : > { %v935_v37 = vsel %vm934_vm6, %v927_v35, %v929_v26 }
  0xa9   : > { %1998 = vmatpush1.msk.msra.mxu0 %vm271_vm2, %v935_v37 }
  0xaa   : > { %1999 = vmatmul.mubr.msk.f32.vlgmr.msra.gmra.mxu0 %vm267_vm3, %v1996_v36 }
  0xab   : > { %v933_v38 = vpop.permute.xlu1 %932  ;;  %v1104_v39 = vpop.permute.xlu0 %1103  ;;  %1184 = vmatprep.mubr.f32.mxu0 %v2247_v0 }
  0xac   : > { %v937_v40 = vsel %vm934_vm6, %v931_v31, %v933_v38  ;;  %v1109_v41 = vsel %vm1107_vm7, %v1102_v34, %v1104_v39 }
  0xad   : > { %2069 = vmatpush3.msk.msra.mxu1 %vm271_vm2, %v937_v40  ;;  %2003 = vmatprep.subr.msk.mxu0 %vm271_vm2, %v1109_v41 }
  0xae   : > { %2073 = vmatprep.subr.mxu1 %v2247_v0  ;;  %2071 = vmatmul.mubr.msk.f32.vlgmr.msra.gmra.mxu1 %vm267_vm3, %v1996_v36 }
  0xaf   : > { %v1275_v42 = vpop.permute.xlu1 %1274  ;;  %v1100_v43 = vpop.permute.xlu0 %1099  ;;  %2075 = vmatprep.mubr.msk.f32.mxu1 %vm2248_vm0, %v2247_v0 }
  0xb0   : > { %v1108_v45 = vsel %vm1107_vm7, %v1100_v43, %v1102_v34 }
  0xb1   : > { %2004 = vmatpush1.msk.msra.mxu0 %vm271_vm2, %v1108_v45 }
  0xb2   : > { %2005 = vmatmul.mubr.msk.f32.vlgmr.msra.gmra.mxu0 %vm267_vm3, %v2002_v44 }
  0xb3   : > { %v1106_v46 = vpop.permute.xlu1 %1105  ;;  %v1277_v47 = vpop.permute.xlu0 %1276  ;;  %1357 = vmatprep.mubr.f32.mxu0 %v2247_v0 }
  0xb4   : > { %v1110_v48 = vsel %vm1107_vm7, %v1104_v39, %v1106_v46  ;;  %v1282_v49 = vsel %vm1280_vm8, %v1275_v42, %v1277_v47  ;;  %v1785_v39 = vlaneseq }
  0xb5   : > { %2074 = vmatpush3.msk.msra.mxu1 %vm271_vm2, %v1110_v48  ;;  %2009 = vmatprep.subr.msk.mxu0 %vm271_vm2, %v1282_v49 }
  0xb6   : > { %2076 = vmatmul.mubr.msk.f32.vlgmr.msra.gmra.mxu1 %vm267_vm3, %v2002_v44  ;;  %2078 = vmatprep.subr.mxu1 %v2247_v0  ;;  %v1786_v46 = vshrl.u32 %v1785_v39, 7 }
  0xb7   : > { %v1448_v50 = vpop.permute.xlu1 %1447  ;;  %v1273_v51 = vpop.permute.xlu0 %1272  ;;  %2080 = vmatprep.mubr.msk.f32.mxu1 %vm2248_vm0, %v2247_v0 }
  0xb8   : > { %v1281_v53 = vsel %vm1280_vm8, %v1273_v51, %v1275_v42 }
  0xb9   : > { %2010 = vmatpush1.msk.msra.mxu0 %vm271_vm2, %v1281_v53 }
  0xba   : > { %2011 = vmatmul.mubr.msk.f32.vlgmr.msra.gmra.mxu0 %vm267_vm3, %v2008_v52 }
  0xbb   : > { %v1279_v54 = vpop.permute.xlu1 %1278  ;;  %v1450_v55 = vpop.permute.xlu0 %1449  ;;  %1530 = vmatprep.mubr.f32.mxu0 %v2247_v0 }
  0xbc   : > { %v1283_v56 = vsel %vm1280_vm8, %v1277_v47, %v1279_v54  ;;  %v1455_v57 = vsel %vm1453_vm9, %v1448_v50, %v1450_v55  ;;  %v1783_v54 = vld [vmem:[%s2556_s3] sm:$0x7] }
  0xbd   : > { %2079 = vmatpush3.msk.msra.mxu1 %vm271_vm2, %v1283_v56  ;;  %2015 = vmatprep.subr.msk.mxu0 %vm271_vm2, %v1455_v57 }
  0xbe   : > { %2081 = vmatmul.mubr.msk.f32.vlgmr.msra.gmra.mxu1 %vm267_vm3, %v2008_v52  ;;  %2083 = vmatprep.subr.mxu1 %v2247_v0  ;;  %v1787_v52 = vsub.s32 0, %v1786_v46 }
  0xbf   : > { %v1621_v58 = vpop.permute.xlu1 %1620  ;;  %v1446_v59 = vpop.permute.xlu0 %1445  ;;  %2085 = vmatprep.mubr.msk.f32.mxu1 %vm2248_vm0, %v2247_v0 }
  0xc0   : > { %v1454_v61 = vsel %vm1453_vm9, %v1446_v59, %v1448_v50  ;;  %v1791_v59 = vsub.s32 1, %v1786_v46 }
  0xc1   : > { %2016 = vmatpush1.msk.msra.mxu0 %vm271_vm2, %v1454_v61 }
  0xc2   : > { %2017 = vmatmul.mubr.msk.f32.vlgmr.msra.gmra.mxu0 %vm267_vm3, %v2014_v60 }
  0xc3   : > { %v1452_v62 = vpop.permute.xlu1 %1451  ;;  %v1623_v63 = vpop.permute.xlu0 %1622  ;;  %1703 = vmatprep.mubr.f32.mxu0 %v2247_v0 }
  0xc4   : > { %v1456_v1 = vsel %vm1453_vm9, %v1450_v55, %v1452_v62  ;;  %v1628_v2 = vsel %vm1626_vm10, %v1621_v58, %v1623_v63  ;;  %v1795_v55 = vsub.s32 2, %v1786_v46 }
  0xc5   : > { %2084 = vmatpush3.msk.msra.mxu1 %vm271_vm2, %v1456_v1  ;;  %2021 = vmatprep.subr.msk.mxu0 %vm271_vm2, %v1628_v2  ;;  %v1788_v2 = vrot.slane %v1783_v54, %v1787_v52 }
  0xc6   : > { %2086 = vmatmul.mubr.msk.f32.vlgmr.msra.gmra.mxu1 %vm267_vm3, %v2014_v60  ;;  %2088 = vmatprep.subr.mxu1 %v2247_v0 }
  0xc7   : > { %v1625_v3 = vpop.permute.xlu1 %1624  ;;  %v1619_v4 = vpop.permute.xlu0 %1618  ;;  %2090 = vmatprep.mubr.msk.f32.mxu1 %vm2248_vm0, %v2247_v0 }
  0xc8   : > { %v1629_v6 = vsel %vm1626_vm10, %v1623_v63, %v1625_v3  ;;  %v1627_v7 = vsel %vm1626_vm10, %v1619_v4, %v1621_v58 }
  0xc9   : > { %2022 = vmatpush1.msk.msra.mxu0 %vm271_vm2, %v1627_v7  ;;  %2089 = vmatpush3.msk.msra.mxu1 %vm271_vm2, %v1629_v6 }
  0xca   : > { %2023 = vmatmul.mubr.msk.f32.vlgmr.msra.gmra.mxu0 %vm267_vm3, %v2020_v5  ;;  %2091 = vmatmul.mubr.msk.f32.vlgmr.msra.gmra.mxu1 %vm267_vm3, %v2020_v5  ;;  %v1796_v5 = vrot.slane %v1783_v54, %v1795_v55 }
 0x153   : > { %v344_v8 = vpop.f32.mrf.mxu0 }
 0x155   : > { %v346_v9 = vpop.f32.mrf.mxu0 }
 0x156   : > { %v415_v10 = vpop.f32.mrf.mxu1 }
 0x157   : > { %v497_v0 = vpop.f32.mrf.mxu0 }
 0x158   : > { %v2052_v11 = vpop.f32.mrf.mxu1  ;;  %v498_v27 = vadd.f32 %v497_v0, %v344_v8 }
 0x159   : > { %v499_v13 = vpop.f32.mrf.mxu0 }
 0x15a   : > { %v568_v12 = vpop.f32.mrf.mxu1  ;;  %v500_v32 = vadd.f32 %v499_v13, %v346_v9  ;;  %v1792_v9 = vrot.slane %v1783_v54, %v1791_v59 }
 0x15b   : > { %v667_v16 = vpop.f32.mrf.mxu0  ;;  %v569_v28 = vadd.f32 %v568_v12, %v415_v10 }
 0x15c   : > { %v2057_v14 = vpop.f32.mrf.mxu1  ;;  %v742_v33 = vadd.f32 %v667_v16, %v498_v27 }
 0x15d   : > { %v669_v18 = vpop.f32.mrf.mxu0 }
 0x15e   : > { %v738_v15 = vpop.f32.mrf.mxu1  ;;  %v743_v36 = vadd.f32 %v669_v18, %v500_v32 }
 0x15f   : > { %v744_v34 = vadd.f32 %v738_v15, %v569_v28 }
 0x160   : > { %v2062_v17 = vpop.f32.mrf.mxu1 }
 0x162   : > { %v840_v20 = vpop.f32.mrf.mxu0 }
 0x163   : > { %v915_v37 = vadd.f32 %v840_v20, %v742_v33 }
 0x164   : > { %v842_v22 = vpop.f32.mrf.mxu0 }
 0x165   : > { %v916_v43 = vadd.f32 %v842_v22, %v743_v36  ;;  %v2257_v22 = vmov 1  }
 0x166   : > { %v911_v19 = vpop.f32.mrf.mxu1  ;;  %2163 = vset.pattern.permute.xlu1 %v2257_v22 }
 0x167   : > { %v917_v38 = vadd.f32 %v911_v19, %v744_v34 }
 0x168   : > { %v2067_v21 = vpop.f32.mrf.mxu1 }
 0x16a   : > { %v1013_v24 = vpop.f32.mrf.mxu0 }
 0x16b   : > { %v1088_v44 = vadd.f32 %v1013_v24, %v915_v37 }
 0x16c   : > { %v1015_v26 = vpop.f32.mrf.mxu0 }
 0x16d   : > { %v1089_v49 = vadd.f32 %v1015_v26, %v916_v43 }
 0x16e   : > { %v1084_v23 = vpop.f32.mrf.mxu1 }
 0x16f   : > { %v1090_v45 = vadd.f32 %v1084_v23, %v917_v38 }
 0x170   : > { %v2072_v25 = vpop.f32.mrf.mxu1 }
 0x172   : > { %v1186_v30 = vpop.f32.mrf.mxu0 }
 0x173   : > { %v1261_v50 = vadd.f32 %v1186_v30, %v1088_v44  ;;  %v2258_v30 = vmov 2  }
 0x174   : > { %v1188_v35 = vpop.f32.mrf.mxu0  ;;  %2164 = vset.pattern.permute.xlu0 %v2258_v30 }
 0x175   : > { %v1262_v56 = vadd.f32 %v1188_v35, %v1089_v49 }
 0x176   : > { %v1257_v29 = vpop.f32.mrf.mxu1 }
 0x177   : > { %v1263_v51 = vadd.f32 %v1257_v29, %v1090_v45 }
 0x178   : > { %v2077_v31 = vpop.f32.mrf.mxu1 }
 0x179   : > { %v1818_v31 = vld [vmem:[%s2555_s2] sm:$0xff] }
 0x17a   : > { %v1359_v40 = vpop.f32.mrf.mxu0 }
 0x17b   : > { %v1434_v57 = vadd.f32 %v1359_v40, %v1261_v50 }
 0x17c   : > { %v1361_v47 = vpop.f32.mrf.mxu0 }
 0x17d   : > { %v1435_v62 = vadd.f32 %v1361_v47, %v1262_v56 }
 0x17e   : > { %v1430_v41 = vpop.f32.mrf.mxu1 }
 0x17f   : > { %v1436_v58 = vadd.f32 %v1430_v41, %v1263_v51 }
 0x180   : > { %v2082_v42 = vpop.f32.mrf.mxu1 }
 0x182   : > { %v1532_v48 = vpop.f32.mrf.mxu0 }
 0x183   : > { %v1607_v63 = vadd.f32 %v1532_v48, %v1434_v57 }
 0x184   : > { %v1534_v60 = vpop.f32.mrf.mxu0 }
 0x185   : > { %v1608_v6 = vadd.f32 %v1534_v60, %v1435_v62 }
 0x186   : > { %v1603_v53 = vpop.f32.mrf.mxu1 }
 0x187   : > { %v1609_v1 = vadd.f32 %v1603_v53, %v1436_v58 }
 0x188   : > { %v2087_v61 = vpop.f32.mrf.mxu1 }
 0x18a   : > { %v1705_v3 = vpop.f32.mrf.mxu0  ;;  %v1776_v4 = vpop.f32.mrf.mxu1 }
 0x18b   : > { %v1780_v7 = vadd.f32 %v1705_v3, %v1607_v63  ;;  %v1782_v8 = vadd.f32 %v1776_v4, %v1609_v1 }
 0x18c   : > { %v1707_v10 = vpop.f32.mrf.mxu0  ;;  %v2092_v0 = vpop.f32.mrf.mxu1 }
 0x18d   : > { %v1800_v11 = vmul.f32 %v1788_v2, %v1780_v7  ;;  %v1781_v12 = vadd.f32 %v1707_v10, %v1608_v6  ;;  %v1802_v14 = vmul.f32 %v1796_v5, %v1782_v8 }
 0x18f   : > { %v1801_v13 = vmul.f32 %v1792_v9, %v1781_v12  ;;  %v1808_v15 = vmul.f32 %v1800_v11, %v1780_v7  ;;  %v1810_v19 = vmul.f32 %v1802_v14, %v1782_v8 }
 0x191   : > { %v1809_v16 = vmul.f32 %v1801_v13, %v1781_v12  ;;  %v1803_v17 = vadd.f32 %v1801_v13, %v1800_v11 }
 0x193   : > { %v1804_v18 = vadd.f32 %v1803_v17, %v1802_v14  ;;  %v1811_v20 = vadd.f32 %v1809_v16, %v1808_v15 }
 0x195   : > { %1805 = vadd.xlane.f32.xlu0 %v1804_v18  ;;  %v1812_v21 = vadd.f32 %v1811_v20, %v1810_v19 }
 0x197   : > { %1813 = vadd.xlane.f32.xlu1 %v1812_v21 }
 0x21e   : > { %v1806_v23 = vpop.xlane.xlu0 %1805 }
 0x21f   : > { %v1807_v24 = vmul.f32 0.00390625, %v1806_v23 }
 0x220   : > { %v1814_v25 = vpop.xlane.xlu1 %1813 }
 0x221   : > { %v1816_v26 = vmul.f32 %v1807_v24, %v1807_v24  ;;  %v1815_v27 = vmul.f32 0.00390625, %v1814_v25 }
 0x223   : > { %v1817_v28 = vsub.f32 %v1815_v27, %v1816_v26 }
 0x225   : > { %v1819_v29 = vadd.f32 1e-05, %v1817_v28 }
 0x227   : > { %2167 = vrsqrt.f32 %v1819_v29 }
 0x234   : > { %v2168_v32 = vpop.eup %2167 }
 0x235   : > { %v1821_v33 = vmul.f32 %v2168_v32, %v1818_v31 }
 0x237   : > { %1830 = vperm.xlu1 %2163, %v1821_v33   ;;  %v1822_v34 = vmul.f32 %v1821_v33, %v1807_v24 }
 0x239   : > { %1824 = vrot.lane.b32.xlu0 %v1822_v34, %s2259_s6 }
 0x2ab   : > { %v1825_v35 = vpop.permute.xlu0 %1824 }
 0x2ac   : > { %v1827_v36 = vsub.f32 %v1818_v31, %v1825_v35 }
 0x2ae   : > { %1838 = vperm.xlu0 %2164, %v1827_v36  }
 0x2b2   : > { %v1831_v37 = vpop.permute.xlu1 %1830 }
 0x2b3   : > { %v1833_v38 = vmul.f32 %v1831_v37, %v1780_v7  ;;  %v1834_v39 = vmul.f32 %v1831_v37, %v1781_v12  ;;  %v1835_v40 = vmul.f32 %v1831_v37, %v1782_v8 }
 0x329   : > { %v1839_v41 = vpop.permute.xlu0 %1838 }
 0x32a   : > { %v1841_v42 = vadd.f32 %v1839_v41, %v1833_v38  ;;  %v1842_v43 = vadd.f32 %v1839_v41, %v1834_v39  ;;  %v1843_v44 = vadd.f32 %v1839_v41, %v1835_v40 }
 0x32c   : > { %1844 = vst [vmem:[%s230_s10] sm:$0xff] %v1841_v42  ;;  %1845 = vst [vmem:[%s230_s10 + $0x8] sm:$0xff] %v1842_v43 }
 0x32d   : > { %1846 = vst [vmem:[%s230_s10 + $0x10] sm:$0xff] %v1843_v44 }
 0x32e   : > { %2182 = shalt.err (!%p2179_p5)
}
 0x32f   : > { %s2183_s29 = scalar_lea.hbm %s2507_s14, 384  ;;  %s2187_s6 = scalar_lea.hbm %s2557_s4, 768 }
 0x330   : > { %p2184_p6 = scmp.ne.s32.totalorder %s2507_s14, %s2183_s29  ;;  %p2188_p10 = scmp.lt.s32.totalorder %s2507_s14, %s2557_s4 }
 0x331   : > { %p2189_p11 = scmp.lt.s32.totalorder %s2187_s6, %s2183_s29 }
 0x332   : > { %p2185_p7 = pnand %p2184_p6, %p2326_p4 }
 0x333   : > { %p2190_p12 = por %p2189_p11, %p2188_p10 }
 0x334   : > { %p2186_p9 = pneg %p2185_p7 }
 0x336   : > { %p2191_p13 = pnand %p2190_p12, %p2186_p9 }
 0x338   : > { %2194 = shalt.err (!%p2191_p13)
}
 0x339   : > { %2095 = dma.vmem_to_hbm [thread:$0]  (%p2326_p4), %s2509_s11, 384, %s2507_s14, %s1848_s18  }
 0x33a PF: > { %p2101_p0 = scmp.ge.s32.totalorder %s2245_s20, 2  ;;  %s1876_s9 = sand.u32 1, %s2225_s15  }
 0x33b   : > { %s1877_s10 = scalar_lea.sflag [#allocation3], %s1876_s9 }
 0x33c   : > { %p2098_p1 = pnand %p2101_p0, %p2333_p8 }
 0x33e   : > { %p2099_p2 = pneg %p2098_p1 }
 0x340   : > { %2220 = dma.done.wait (%p2099_p2), %s1877_s10, 384  }
 0x341   : > { %2222 = vsyncadd (%p2099_p2), %s1877_s10, 4294966912  ;;  %s17_s20 = sadd.s32 1, %s2245_s20   ;;  %s2560_s15 = smov %s2229_s16 }
 0x342   : > { %p14_p3 = scmp.ge.s32.totalorder %s17_s20, 4   ;;  %s2561_s16 = smov %s2233_s17 }
 0x343   : > { %s2562_s17 = smov %s2339_s28  ;;  %s2563_s18 = smov %s2241_s19 }
 0x344   : > { %s2564_s19 = smov %s2566_s23  ;;  %16 = sbr.rel (!%p14_p3) target bundleno = 4 (0x4), region = 85 }
 0x349   :  { %1882 = vsyncpa [#allocation3], 1 }
 0x34a   :  { %1884 = vsyncpa [#allocation3 + $0x1], 1 }

</bundles_post_ra>
